<compile_context>
chip_gen: v6e
topology: v6e:2x2x1
jax: 0.10.0
libtpu: 0.0.40
codegen_flags: <defaults>
</compile_context>

<pallas_src>
import functools

import jax
import jax.numpy as jnp
from jax import lax
from jax.experimental import pallas as pl
from jax.experimental.pallas import tpu as pltpu


def _mha_fused_kernel(*refs, num_heads, head_dim, have_mask, mxu_dtype):
    """Grid = (B, num_q_tiles); one (batch, q-tile) per step.

    First q-tile of each batch: K/V projections into persistent VMEM scratch.
    Every q-tile: Q projection -> per-head attention (contexts concatenated
    into VMEM scratch) -> single hidden-wide final FC -> lane-dense output.
    """
    if have_mask:
        (q_ref, k_ref, v_ref, mask_ref,
         wq_ref, wk_ref, wv_ref,
         bq_ref, bk_ref, bv_ref,
         wfc_ref, bfc_ref,
         o_ref,
         k_scr, v_scr, q_scr, ctx_scr) = refs
    else:
        (q_ref, k_ref, v_ref,
         wq_ref, wk_ref, wv_ref,
         bq_ref, bk_ref, bv_ref,
         wfc_ref, bfc_ref,
         o_ref,
         k_scr, v_scr, q_scr, ctx_scr) = refs
        mask_ref = None

    # --- K/V projections: only on the first q-tile of each batch ------------
    # (the k/v blocks are batch-indexed, so this amortizes the 2*S*hidden^2
    #  MACs over all q-tiles instead of redoing them per tile).
    @pl.when(pl.program_id(1) == 0)
    def _project_kv():
        K = jnp.dot(k_ref[0], wk_ref[...],
                    preferred_element_type=jnp.float32) + bk_ref[...]
        V = jnp.dot(v_ref[0], wv_ref[...],
                    preferred_element_type=jnp.float32) + bv_ref[...]
        k_scr[...] = K.astype(mxu_dtype)
        v_scr[...] = V.astype(mxu_dtype)

    # --- Q projection for this q-tile (1/sqrt(head_dim) pre-folded) ---------
    Q = jnp.dot(q_ref[0], wq_ref[...],
                preferred_element_type=jnp.float32) + bq_ref[...]
    q_scr[...] = Q.astype(mxu_dtype)

    if have_mask:
        # Additive score bias computed once per q-tile, shared by all heads.
        bias = jnp.where(mask_ref[0] == 0, jnp.float32(-1e9), jnp.float32(0.0))

    # --- Per-head attention (static loop over static ref slices) ------------
    for h in range(num_heads):
        lo = h * head_dim
        hi = lo + head_dim
        Qh = q_scr[:, lo:hi]                          # (block_q, hd) mxu_dtype
        Kh = k_scr[:, lo:hi]                          # (S, hd)
        Vh = v_scr[:, lo:hi]                          # (S, hd)

        # scores = Qh @ Kh^T via contraction dims (no explicit transpose op).
        s = lax.dot_general(Qh, Kh, (((1,), (1,)), ((), ())),
                            preferred_element_type=jnp.float32)
        if have_mask:
            s = s + bias

        # Softmax over keys, strictly f32; reciprocal on the EUP slot.
        s = s - jnp.max(s, axis=-1, keepdims=True)
        e = jnp.exp(s)
        p = e * pl.reciprocal(jnp.sum(e, axis=-1, keepdims=True), approx=True)

        ctx = jnp.dot(p.astype(mxu_dtype), Vh,
                      preferred_element_type=jnp.float32)        # (block_q, hd)
        ctx_scr[:, lo:hi] = ctx.astype(mxu_dtype)                # concat-by-store

    # --- Fused final projection: ONE hidden-wide, lane-dense MXU matmul -----
    out = jnp.dot(ctx_scr[...], wfc_ref[...],
                  preferred_element_type=jnp.float32) + bfc_ref[...]
    o_ref[0] = out.astype(o_ref.dtype)


def _pick_block_q(S):
    """Largest MXU-friendly divisor of S; never < 8 unless block_q == S."""
    for cand in (512, 256, 128, 64, 32, 16, 8):
        if cand <= S and S % cand == 0:
            return cand
    return S   # S < 8 or not a multiple of 8: a single full-S tile is legal.


def multi_head_attention(query, key, value, params, mask=None, *,
                         mxu_dtype=jnp.bfloat16, block_q=None,
                         vmem_limit_bytes=48 * 1024 * 1024):
    """query/key/value: (B, S, hidden) float32. Returns (B, S, hidden) float32."""
    B, S, hidden = query.shape
    wq, wk, wv = params["wq"], params["wk"], params["wv"]   # (H, head_dim, hidden)
    bq, bk, bv = params["bq"], params["bk"], params["bv"]   # (H, 1, head_dim)
    w_fc, b_fc = params["w_fc"], params["b_fc"]             # (hidden, hidden), (1, hidden)
    H, head_dim, _ = wq.shape
    assert H * head_dim == hidden

    # --- One-time host-side layout changes (no in-kernel transposes) --------
    def _fuse_heads(w):   # (H, hd, hidden) -> (hidden, H*hd): kernel does x @ W
        return jnp.transpose(w, (2, 0, 1)).reshape(hidden, H * head_dim)

    scale = 1.0 / (head_dim ** 0.5)
    wq_all = (_fuse_heads(wq) * scale).astype(mxu_dtype)     # scale folded in
    wk_all = _fuse_heads(wk).astype(mxu_dtype)
    wv_all = _fuse_heads(wv).astype(mxu_dtype)
    bq_all = (bq.reshape(1, hidden) * scale).astype(jnp.float32)
    bk_all = bk.reshape(1, hidden).astype(jnp.float32)
    bv_all = bv.reshape(1, hidden).astype(jnp.float32)
    wfc_t = w_fc.T.astype(mxu_dtype)                         # (hidden_in, hidden_out)
    bfc = b_fc.reshape(1, hidden).astype(jnp.float32)

    qc = query.astype(mxu_dtype)
    kc = key.astype(mxu_dtype)
    vc = value.astype(mxu_dtype)

    if block_q is None:
        block_q = _pick_block_q(S)
    assert S % block_q == 0
    num_q_tiles = S // block_q

    have_mask = mask is not None

    q_spec = pl.BlockSpec((1, block_q, hidden), lambda b, qi: (b, qi, 0))
    kv_spec = pl.BlockSpec((1, S, hidden), lambda b, qi: (b, 0, 0))
    w_spec = pl.BlockSpec((hidden, hidden), lambda b, qi: (0, 0))
    b_spec = pl.BlockSpec((1, hidden), lambda b, qi: (0, 0))
    out_spec = pl.BlockSpec((1, block_q, hidden), lambda b, qi: (b, qi, 0))

    inputs = [qc, kc, vc]
    in_specs = [q_spec, kv_spec, kv_spec]
    if have_mask:
        mask3 = mask.astype(jnp.int32).reshape(B, 1, S)
        inputs.append(mask3)
        in_specs.append(pl.BlockSpec((1, 1, S), lambda b, qi: (b, 0, 0)))
    inputs += [wq_all, wk_all, wv_all, bq_all, bk_all, bv_all, wfc_t, bfc]
    in_specs += [w_spec, w_spec, w_spec, b_spec, b_spec, b_spec, w_spec, b_spec]

    kernel = functools.partial(
        _mha_fused_kernel,
        num_heads=H, head_dim=head_dim,
        have_mask=have_mask, mxu_dtype=mxu_dtype)

    # Advisory cost estimate: 4 hidden-wide projections + QK^T + PV per token.
    itemsize = jnp.dtype(mxu_dtype).itemsize
    flops = 2 * B * S * hidden * (4 * hidden + 2 * S)
    bytes_accessed = (3 * B * S * hidden * itemsize          # q, k, v
                      + B * S * hidden * 4                   # f32 output
                      + 4 * hidden * hidden * itemsize       # weights
                      + 4 * hidden * 4)                      # biases
    cost = pl.CostEstimate(flops=flops,
                           transcendentals=B * H * S * S,
                           bytes_accessed=bytes_accessed)

    out = pl.pallas_call(
        kernel,
        out_shape=jax.ShapeDtypeStruct((B, S, hidden), jnp.float32),
        grid_spec=pltpu.PrefetchScalarGridSpec(
            num_scalar_prefetch=0,
            grid=(B, num_q_tiles),
            in_specs=in_specs,
            out_specs=out_spec,
            scratch_shapes=[
                pltpu.VMEM((S, hidden), mxu_dtype),        # projected K (per batch)
                pltpu.VMEM((S, hidden), mxu_dtype),        # projected V (per batch)
                pltpu.VMEM((block_q, hidden), mxu_dtype),  # projected Q (per tile)
                pltpu.VMEM((block_q, hidden), mxu_dtype),  # concat'd head contexts
            ],
        ),
        compiler_params=pltpu.CompilerParams(
            # Batch axis parallel (megacore sharding); q-tile axis must be
            # sequential so the per-batch K/V scratch written at qi == 0 stays
            # valid for the remaining q-tiles of that batch.
            dimension_semantics=("parallel", "arbitrary"),
            vmem_limit_bytes=vmem_limit_bytes,
        ),
        cost_estimate=cost,
    )(*inputs)
    return out


def _reference(query, key, value, params, mask=None):
    """Pure-JAX reference mirroring the torch forward pass (f32 throughout)."""
    wq, wk, wv = params["wq"], params["wk"], params["wv"]
    bq, bk, bv = params["bq"], params["bk"], params["bv"]
    H, head_dim, _ = wq.shape
    outs = []
    for h in range(H):
        Q = query @ wq[h].T + bq[h, 0]
        K = key @ wk[h].T + bk[h, 0]
        V = value @ wv[h].T + bv[h, 0]
        s = jnp.einsum("bqd,bkd->bqk", Q, K) / (head_dim ** 0.5)
        if mask is not None:
            s = jnp.where(mask[:, None, :].astype(jnp.int32) == 0, -1e9, s)
        a = jax.nn.softmax(s, axis=-1)
        outs.append(jnp.einsum("bqk,bkd->bqd", a, V))
    cat = jnp.concatenate(outs, axis=-1)
    return cat @ params["w_fc"].T + params["b_fc"]


def _init_params(key, hidden, num_heads, head_dim):
    """Deterministic init mimicking nn.Linear (uniform ±1/sqrt(fan_in))."""
    ks = jax.random.split(key, 8)
    lim_h = 1.0 / (hidden ** 0.5)
    shape_w = (num_heads, head_dim, hidden)
    shape_b = (num_heads, 1, head_dim)
    return {
        "wq": jax.random.uniform(ks[0], shape_w, jnp.float32, -lim_h, lim_h),
        "wk": jax.random.uniform(ks[1], shape_w, jnp.float32, -lim_h, lim_h),
        "wv": jax.random.uniform(ks[2], shape_w, jnp.float32, -lim_h, lim_h),
        "bq": jax.random.uniform(ks[3], shape_b, jnp.float32, -lim_h, lim_h),
        "bk": jax.random.uniform(ks[4], shape_b, jnp.float32, -lim_h, lim_h),
        "bv": jax.random.uniform(ks[5], shape_b, jnp.float32, -lim_h, lim_h),
        "w_fc": jax.random.uniform(ks[6], (hidden, hidden), jnp.float32, -lim_h, lim_h),
        "b_fc": jax.random.uniform(ks[7], (1, hidden), jnp.float32, -lim_h, lim_h),
    }


if __name__ == "__main__":
    B, S, hidden, num_heads = 2, 8, 32, 4
    head_dim = hidden // num_heads

    key = jax.random.PRNGKey(0)
    k_p, k_q, k_k, k_v = jax.random.split(key, 4)
    params = _init_params(k_p, hidden, num_heads, head_dim)

    query = jax.random.normal(k_q, (B, S, hidden), jnp.float32)
    key_t = jax.random.normal(k_k, (B, S, hidden), jnp.float32)
    value = jax.random.normal(k_v, (B, S, hidden), jnp.float32)

    mask = jnp.ones((B, S), jnp.int32).at[:, -2:].set(0)

    ref = _reference(query, key_t, value, params, mask=None)
    ref_m = _reference(query, key_t, value, params, mask=mask)

    # Default path: bf16 MXU inputs, f32 accumulation + f32 softmax.
    out = jax.block_until_ready(
        multi_head_attention(query, key_t, value, params, mask=None))
    assert out.shape == (B, S, hidden)
    assert jnp.allclose(out, ref, atol=5e-2, rtol=5e-2), "bf16 mismatch vs reference"

    out_m = jax.block_until_ready(
        multi_head_attention(query, key_t, value, params, mask=mask))
    assert jnp.allclose(out_m, ref_m, atol=5e-2, rtol=5e-2), "bf16 masked mismatch"

    # f32 MXU path (tighter tolerance).
    out_f32 = jax.block_until_ready(
        multi_head_attention(query, key_t, value, params, mask=None,
                             mxu_dtype=jnp.float32))
    assert jnp.allclose(out_f32, ref, atol=2e-3, rtol=2e-3), "f32 mismatch vs reference"

    out_f32_m = jax.block_until_ready(
        multi_head_attention(query, key_t, value, params, mask=mask,
                             mxu_dtype=jnp.float32))
    assert jnp.allclose(out_f32_m, ref_m, atol=2e-3, rtol=2e-3), "f32 masked mismatch"

    print("KERNEL_OK")
</pallas_src>

<mosaic_0001>
module attributes {stable_mosaic.version = 11 : i64} {
  func.func @_mha_fused_kernel(%arg0: i32, %arg1: i32, %arg2: memref<1x8x32xbf16, #tpu.memory_space<vmem>>, %arg3: memref<1x8x32xbf16, #tpu.memory_space<vmem>>, %arg4: memref<1x8x32xbf16, #tpu.memory_space<vmem>>, %arg5: memref<32x32xbf16, #tpu.memory_space<vmem>>, %arg6: memref<32x32xbf16, #tpu.memory_space<vmem>>, %arg7: memref<32x32xbf16, #tpu.memory_space<vmem>>, %arg8: memref<1x32xf32, #tpu.memory_space<vmem>>, %arg9: memref<1x32xf32, #tpu.memory_space<vmem>>, %arg10: memref<1x32xf32, #tpu.memory_space<vmem>>, %arg11: memref<32x32xbf16, #tpu.memory_space<vmem>>, %arg12: memref<1x32xf32, #tpu.memory_space<vmem>>, %arg13: memref<1x8x32xf32, #tpu.memory_space<vmem>>, %arg14: memref<8x32xbf16, #tpu.memory_space<vmem>>, %arg15: memref<8x32xbf16, #tpu.memory_space<vmem>>, %arg16: memref<8x32xbf16, #tpu.memory_space<vmem>>, %arg17: memref<8x32xbf16, #tpu.memory_space<vmem>>) attributes {dimension_semantics = [#tpu.dimension_semantics<parallel>, #tpu.dimension_semantics<arbitrary>], iteration_bounds = array<i64: 2, 1>, scalar_prefetch = 0 : i64, scratch_operands = 4 : i64, tpu.core_type = #tpu.core_type<tc>, window_params = [{transform_indices = @transform_0, window_bounds = array<i64: 1, 8, 32>}, {transform_indices = @transform_1, window_bounds = array<i64: 1, 8, 32>}, {transform_indices = @transform_2, window_bounds = array<i64: 1, 8, 32>}, {pipeline_mode = #tpu.pipeline_mode<synchronous>, transform_indices = @transform_3, window_bounds = array<i64: 32, 32>}, {pipeline_mode = #tpu.pipeline_mode<synchronous>, transform_indices = @transform_4, window_bounds = array<i64: 32, 32>}, {pipeline_mode = #tpu.pipeline_mode<synchronous>, transform_indices = @transform_5, window_bounds = array<i64: 32, 32>}, {pipeline_mode = #tpu.pipeline_mode<synchronous>, transform_indices = @transform_6, window_bounds = array<i64: 1, 32>}, {pipeline_mode = #tpu.pipeline_mode<synchronous>, transform_indices = @transform_7, window_bounds = array<i64: 1, 32>}, {pipeline_mode = #tpu.pipeline_mode<synchronous>, transform_indices = @transform_8, window_bounds = array<i64: 1, 32>}, {pipeline_mode = #tpu.pipeline_mode<synchronous>, transform_indices = @transform_9, window_bounds = array<i64: 32, 32>}, {pipeline_mode = #tpu.pipeline_mode<synchronous>, transform_indices = @transform_10, window_bounds = array<i64: 1, 32>}, {transform_indices = @transform_11, window_bounds = array<i64: 1, 8, 32>}]} {
    %c0_i32 = arith.constant 0 : i32
    %0 = arith.cmpi eq, %arg1, %c0_i32 : i32
    %1 = arith.extui %0 : i1 to i32
    %c0_i32_0 = arith.constant 0 : i32
    %2 = arith.cmpi ne, %1, %c0_i32_0 : i32
    scf.if %2 {
      %c0_64 = arith.constant 0 : index
      %c0_65 = arith.constant 0 : index
      %c0_66 = arith.constant 0 : index
      %93 = vector.load %arg3[%c0_64, %c0_65, %c0_66] : memref<1x8x32xbf16, #tpu.memory_space<vmem>>, vector<1x8x32xbf16>
      %94 = vector.shape_cast %93 : vector<1x8x32xbf16> to vector<8x32xbf16>
      %c0_67 = arith.constant 0 : index
      %c0_68 = arith.constant 0 : index
      %95 = vector.load %arg6[%c0_67, %c0_68] : memref<32x32xbf16, #tpu.memory_space<vmem>>, vector<32x32xbf16>
      %cst_69 = arith.constant dense<0.000000e+00> : vector<8x32xf32>
      %96 = tpu.matmul %94, %95, %cst_69 {dimension_numbers = #tpu.dot_dimension_numbers<[1], [0], [0], [1], [0, 0, 1, 1], [], []>} : vector<8x32xbf16>, vector<32x32xbf16>, vector<8x32xf32> -> vector<8x32xf32>
      %c0_70 = arith.constant 0 : index
      %c0_71 = arith.constant 0 : index
      %97 = vector.load %arg9[%c0_70, %c0_71] : memref<1x32xf32, #tpu.memory_space<vmem>>, vector<1x32xf32>
      %98 = vector.broadcast %97 : vector<1x32xf32> to vector<8x32xf32>
      %99 = arith.addf %96, %98 : vector<8x32xf32>
      %c0_72 = arith.constant 0 : index
      %c0_73 = arith.constant 0 : index
      %c0_74 = arith.constant 0 : index
      %100 = vector.load %arg4[%c0_72, %c0_73, %c0_74] : memref<1x8x32xbf16, #tpu.memory_space<vmem>>, vector<1x8x32xbf16>
      %101 = vector.shape_cast %100 : vector<1x8x32xbf16> to vector<8x32xbf16>
      %c0_75 = arith.constant 0 : index
      %c0_76 = arith.constant 0 : index
      %102 = vector.load %arg7[%c0_75, %c0_76] : memref<32x32xbf16, #tpu.memory_space<vmem>>, vector<32x32xbf16>
      %cst_77 = arith.constant dense<0.000000e+00> : vector<8x32xf32>
      %103 = tpu.matmul %101, %102, %cst_77 {dimension_numbers = #tpu.dot_dimension_numbers<[1], [0], [0], [1], [0, 0, 1, 1], [], []>} : vector<8x32xbf16>, vector<32x32xbf16>, vector<8x32xf32> -> vector<8x32xf32>
      %c0_78 = arith.constant 0 : index
      %c0_79 = arith.constant 0 : index
      %104 = vector.load %arg10[%c0_78, %c0_79] : memref<1x32xf32, #tpu.memory_space<vmem>>, vector<1x32xf32>
      %105 = vector.broadcast %104 : vector<1x32xf32> to vector<8x32xf32>
      %106 = arith.addf %103, %105 : vector<8x32xf32>
      %107 = arith.truncf %99 : vector<8x32xf32> to vector<8x32xbf16>
      %c0_80 = arith.constant 0 : index
      %c0_81 = arith.constant 0 : index
      %108 = vector.load %arg14[%c0_80, %c0_81] : memref<8x32xbf16, #tpu.memory_space<vmem>>, vector<8x32xbf16>
      tpu.vector_store %arg14[%c0_80, %c0_81], %107 {strides = array<i32>} : memref<8x32xbf16, #tpu.memory_space<vmem>>, vector<8x32xbf16>,
      %109 = arith.truncf %106 : vector<8x32xf32> to vector<8x32xbf16>
      %c0_82 = arith.constant 0 : index
      %c0_83 = arith.constant 0 : index
      %110 = vector.load %arg15[%c0_82, %c0_83] : memref<8x32xbf16, #tpu.memory_space<vmem>>, vector<8x32xbf16>
      tpu.vector_store %arg15[%c0_82, %c0_83], %109 {strides = array<i32>} : memref<8x32xbf16, #tpu.memory_space<vmem>>, vector<8x32xbf16>,
    } else {
    }
    %c0 = arith.constant 0 : index
    %c0_1 = arith.constant 0 : index
    %c0_2 = arith.constant 0 : index
    %3 = vector.load %arg2[%c0, %c0_1, %c0_2] : memref<1x8x32xbf16, #tpu.memory_space<vmem>>, vector<1x8x32xbf16>
    %4 = vector.shape_cast %3 : vector<1x8x32xbf16> to vector<8x32xbf16>
    %c0_3 = arith.constant 0 : index
    %c0_4 = arith.constant 0 : index
    %5 = vector.load %arg5[%c0_3, %c0_4] : memref<32x32xbf16, #tpu.memory_space<vmem>>, vector<32x32xbf16>
    %cst = arith.constant dense<0.000000e+00> : vector<8x32xf32>
    %6 = tpu.matmul %4, %5, %cst {dimension_numbers = #tpu.dot_dimension_numbers<[1], [0], [0], [1], [0, 0, 1, 1], [], []>} : vector<8x32xbf16>, vector<32x32xbf16>, vector<8x32xf32> -> vector<8x32xf32>
    %c0_5 = arith.constant 0 : index
    %c0_6 = arith.constant 0 : index
    %7 = vector.load %arg8[%c0_5, %c0_6] : memref<1x32xf32, #tpu.memory_space<vmem>>, vector<1x32xf32>
    %8 = vector.broadcast %7 : vector<1x32xf32> to vector<8x32xf32>
    %9 = arith.addf %6, %8 : vector<8x32xf32>
    %10 = arith.truncf %9 : vector<8x32xf32> to vector<8x32xbf16>
    %c0_7 = arith.constant 0 : index
    %c0_8 = arith.constant 0 : index
    %11 = vector.load %arg16[%c0_7, %c0_8] : memref<8x32xbf16, #tpu.memory_space<vmem>>, vector<8x32xbf16>
    tpu.vector_store %arg16[%c0_7, %c0_8], %10 {strides = array<i32>} : memref<8x32xbf16, #tpu.memory_space<vmem>>, vector<8x32xbf16>,
    %c0_9 = arith.constant 0 : index
    %c0_10 = arith.constant 0 : index
    %12 = vector.load %arg16[%c0_9, %c0_10] : memref<8x32xbf16, #tpu.memory_space<vmem>>, vector<8x8xbf16>
    %c0_11 = arith.constant 0 : index
    %c0_12 = arith.constant 0 : index
    %13 = vector.load %arg14[%c0_11, %c0_12] : memref<8x32xbf16, #tpu.memory_space<vmem>>, vector<8x8xbf16>
    %c0_13 = arith.constant 0 : index
    %c0_14 = arith.constant 0 : index
    %14 = vector.load %arg15[%c0_13, %c0_14] : memref<8x32xbf16, #tpu.memory_space<vmem>>, vector<8x8xbf16>
    %cst_15 = arith.constant dense<0.000000e+00> : vector<8x8xf32>
    %15 = tpu.matmul %12, %13, %cst_15 {dimension_numbers = #tpu.dot_dimension_numbers<[1], [1], [0], [0], [0, 0, 1, 0], [], []>} : vector<8x8xbf16>, vector<8x8xbf16>, vector<8x8xf32> -> vector<8x8xf32>
    %cst_16 = arith.constant dense<0xFF800000> : vector<8xf32>
    %16 = vector.multi_reduction <maximumf>, %15, %cst_16 [1] : vector<8x8xf32> to vector<8xf32>
    %17 = vector.shape_cast %16 : vector<8xf32> to vector<8x1xf32>
    %18 = vector.broadcast %17 : vector<8x1xf32> to vector<8x8xf32>
    %19 = arith.subf %15, %18 : vector<8x8xf32>
    %20 = math.exp %19 : vector<8x8xf32>
    %cst_17 = arith.constant dense<0.000000e+00> : vector<8xf32>
    %21 = vector.multi_reduction <add>, %20, %cst_17 [1] : vector<8x8xf32> to vector<8xf32>
    %22 = vector.shape_cast %21 : vector<8xf32> to vector<8x1xf32>
    %23 = tpu.reciprocal %22 {approx = true} : vector<8x1xf32> -> vector<8x1xf32>
    %24 = vector.broadcast %23 : vector<8x1xf32> to vector<8x8xf32>
    %25 = arith.mulf %20, %24 : vector<8x8xf32>
    %26 = arith.truncf %25 : vector<8x8xf32> to vector<8x8xbf16>
    %cst_18 = arith.constant dense<0.000000e+00> : vector<8x8xf32>
    %27 = tpu.matmul %26, %14, %cst_18 {dimension_numbers = #tpu.dot_dimension_numbers<[1], [0], [0], [1], [0, 0, 1, 1], [], []>} : vector<8x8xbf16>, vector<8x8xbf16>, vector<8x8xf32> -> vector<8x8xf32>
    %28 = arith.truncf %27 : vector<8x8xf32> to vector<8x8xbf16>
    %c0_19 = arith.constant 0 : index
    %c0_20 = arith.constant 0 : index
    %29 = vector.load %arg17[%c0_19, %c0_20] : memref<8x32xbf16, #tpu.memory_space<vmem>>, vector<8x8xbf16>
    tpu.vector_store %arg17[%c0_19, %c0_20], %28 {strides = array<i32>} : memref<8x32xbf16, #tpu.memory_space<vmem>>, vector<8x8xbf16>,
    %c0_21 = arith.constant 0 : index
    %c8 = arith.constant 8 : index
    %30 = vector.load %arg16[%c0_21, %c8] : memref<8x32xbf16, #tpu.memory_space<vmem>>, vector<8x8xbf16>
    %c0_22 = arith.constant 0 : index
    %c8_23 = arith.constant 8 : index
    %31 = vector.load %arg14[%c0_22, %c8_23] : memref<8x32xbf16, #tpu.memory_space<vmem>>, vector<8x8xbf16>
    %c0_24 = arith.constant 0 : index
    %c8_25 = arith.constant 8 : index
    %32 = vector.load %arg15[%c0_24, %c8_25] : memref<8x32xbf16, #tpu.memory_space<vmem>>, vector<8x8xbf16>
    %cst_26 = arith.constant dense<0.000000e+00> : vector<8x8xf32>
    %33 = tpu.matmul %30, %31, %cst_26 {dimension_numbers = #tpu.dot_dimension_numbers<[1], [1], [0], [0], [0, 0, 1, 0], [], []>} : vector<8x8xbf16>, vector<8x8xbf16>, vector<8x8xf32> -> vector<8x8xf32>
    %cst_27 = arith.constant dense<0xFF800000> : vector<8xf32>
    %34 = vector.multi_reduction <maximumf>, %33, %cst_27 [1] : vector<8x8xf32> to vector<8xf32>
    %35 = vector.shape_cast %34 : vector<8xf32> to vector<8x1xf32>
    %36 = vector.broadcast %35 : vector<8x1xf32> to vector<8x8xf32>
    %37 = arith.subf %33, %36 : vector<8x8xf32>
    %38 = math.exp %37 : vector<8x8xf32>
    %cst_28 = arith.constant dense<0.000000e+00> : vector<8xf32>
    %39 = vector.multi_reduction <add>, %38, %cst_28 [1] : vector<8x8xf32> to vector<8xf32>
    %40 = vector.shape_cast %39 : vector<8xf32> to vector<8x1xf32>
    %41 = tpu.reciprocal %40 {approx = true} : vector<8x1xf32> -> vector<8x1xf32>
    %42 = vector.broadcast %41 : vector<8x1xf32> to vector<8x8xf32>
    %43 = arith.mulf %38, %42 : vector<8x8xf32>
    %44 = arith.truncf %43 : vector<8x8xf32> to vector<8x8xbf16>
    %cst_29 = arith.constant dense<0.000000e+00> : vector<8x8xf32>
    %45 = tpu.matmul %44, %32, %cst_29 {dimension_numbers = #tpu.dot_dimension_numbers<[1], [0], [0], [1], [0, 0, 1, 1], [], []>} : vector<8x8xbf16>, vector<8x8xbf16>, vector<8x8xf32> -> vector<8x8xf32>
    %46 = arith.truncf %45 : vector<8x8xf32> to vector<8x8xbf16>
    %c0_30 = arith.constant 0 : index
    %c8_31 = arith.constant 8 : index
    %47 = vector.load %arg17[%c0_30, %c8_31] : memref<8x32xbf16, #tpu.memory_space<vmem>>, vector<8x8xbf16>
    tpu.vector_store %arg17[%c0_30, %c8_31], %46 {strides = array<i32>} : memref<8x32xbf16, #tpu.memory_space<vmem>>, vector<8x8xbf16>,
    %c0_32 = arith.constant 0 : index
    %c16 = arith.constant 16 : index
    %48 = vector.load %arg16[%c0_32, %c16] : memref<8x32xbf16, #tpu.memory_space<vmem>>, vector<8x8xbf16>
    %c0_33 = arith.constant 0 : index
    %c16_34 = arith.constant 16 : index
    %49 = vector.load %arg14[%c0_33, %c16_34] : memref<8x32xbf16, #tpu.memory_space<vmem>>, vector<8x8xbf16>
    %c0_35 = arith.constant 0 : index
    %c16_36 = arith.constant 16 : index
    %50 = vector.load %arg15[%c0_35, %c16_36] : memref<8x32xbf16, #tpu.memory_space<vmem>>, vector<8x8xbf16>
    %cst_37 = arith.constant dense<0.000000e+00> : vector<8x8xf32>
    %51 = tpu.matmul %48, %49, %cst_37 {dimension_numbers = #tpu.dot_dimension_numbers<[1], [1], [0], [0], [0, 0, 1, 0], [], []>} : vector<8x8xbf16>, vector<8x8xbf16>, vector<8x8xf32> -> vector<8x8xf32>
    %cst_38 = arith.constant dense<0xFF800000> : vector<8xf32>
    %52 = vector.multi_reduction <maximumf>, %51, %cst_38 [1] : vector<8x8xf32> to vector<8xf32>
    %53 = vector.shape_cast %52 : vector<8xf32> to vector<8x1xf32>
    %54 = vector.broadcast %53 : vector<8x1xf32> to vector<8x8xf32>
    %55 = arith.subf %51, %54 : vector<8x8xf32>
    %56 = math.exp %55 : vector<8x8xf32>
    %cst_39 = arith.constant dense<0.000000e+00> : vector<8xf32>
    %57 = vector.multi_reduction <add>, %56, %cst_39 [1] : vector<8x8xf32> to vector<8xf32>
    %58 = vector.shape_cast %57 : vector<8xf32> to vector<8x1xf32>
    %59 = tpu.reciprocal %58 {approx = true} : vector<8x1xf32> -> vector<8x1xf32>
    %60 = vector.broadcast %59 : vector<8x1xf32> to vector<8x8xf32>
    %61 = arith.mulf %56, %60 : vector<8x8xf32>
    %62 = arith.truncf %61 : vector<8x8xf32> to vector<8x8xbf16>
    %cst_40 = arith.constant dense<0.000000e+00> : vector<8x8xf32>
    %63 = tpu.matmul %62, %50, %cst_40 {dimension_numbers = #tpu.dot_dimension_numbers<[1], [0], [0], [1], [0, 0, 1, 1], [], []>} : vector<8x8xbf16>, vector<8x8xbf16>, vector<8x8xf32> -> vector<8x8xf32>
    %64 = arith.truncf %63 : vector<8x8xf32> to vector<8x8xbf16>
    %c0_41 = arith.constant 0 : index
    %c16_42 = arith.constant 16 : index
    %65 = vector.load %arg17[%c0_41, %c16_42] : memref<8x32xbf16, #tpu.memory_space<vmem>>, vector<8x8xbf16>
    tpu.vector_store %arg17[%c0_41, %c16_42], %64 {strides = array<i32>} : memref<8x32xbf16, #tpu.memory_space<vmem>>, vector<8x8xbf16>,
    %c0_43 = arith.constant 0 : index
    %c24 = arith.constant 24 : index
    %66 = vector.load %arg16[%c0_43, %c24] : memref<8x32xbf16, #tpu.memory_space<vmem>>, vector<8x8xbf16>
    %c0_44 = arith.constant 0 : index
    %c24_45 = arith.constant 24 : index
    %67 = vector.load %arg14[%c0_44, %c24_45] : memref<8x32xbf16, #tpu.memory_space<vmem>>, vector<8x8xbf16>
    %c0_46 = arith.constant 0 : index
    %c24_47 = arith.constant 24 : index
    %68 = vector.load %arg15[%c0_46, %c24_47] : memref<8x32xbf16, #tpu.memory_space<vmem>>, vector<8x8xbf16>
    %cst_48 = arith.constant dense<0.000000e+00> : vector<8x8xf32>
    %69 = tpu.matmul %66, %67, %cst_48 {dimension_numbers = #tpu.dot_dimension_numbers<[1], [1], [0], [0], [0, 0, 1, 0], [], []>} : vector<8x8xbf16>, vector<8x8xbf16>, vector<8x8xf32> -> vector<8x8xf32>
    %cst_49 = arith.constant dense<0xFF800000> : vector<8xf32>
    %70 = vector.multi_reduction <maximumf>, %69, %cst_49 [1] : vector<8x8xf32> to vector<8xf32>
    %71 = vector.shape_cast %70 : vector<8xf32> to vector<8x1xf32>
    %72 = vector.broadcast %71 : vector<8x1xf32> to vector<8x8xf32>
    %73 = arith.subf %69, %72 : vector<8x8xf32>
    %74 = math.exp %73 : vector<8x8xf32>
    %cst_50 = arith.constant dense<0.000000e+00> : vector<8xf32>
    %75 = vector.multi_reduction <add>, %74, %cst_50 [1] : vector<8x8xf32> to vector<8xf32>
    %76 = vector.shape_cast %75 : vector<8xf32> to vector<8x1xf32>
    %77 = tpu.reciprocal %76 {approx = true} : vector<8x1xf32> -> vector<8x1xf32>
    %78 = vector.broadcast %77 : vector<8x1xf32> to vector<8x8xf32>
    %79 = arith.mulf %74, %78 : vector<8x8xf32>
    %80 = arith.truncf %79 : vector<8x8xf32> to vector<8x8xbf16>
    %cst_51 = arith.constant dense<0.000000e+00> : vector<8x8xf32>
    %81 = tpu.matmul %80, %68, %cst_51 {dimension_numbers = #tpu.dot_dimension_numbers<[1], [0], [0], [1], [0, 0, 1, 1], [], []>} : vector<8x8xbf16>, vector<8x8xbf16>, vector<8x8xf32> -> vector<8x8xf32>
    %82 = arith.truncf %81 : vector<8x8xf32> to vector<8x8xbf16>
    %c0_52 = arith.constant 0 : index
    %c24_53 = arith.constant 24 : index
    %83 = vector.load %arg17[%c0_52, %c24_53] : memref<8x32xbf16, #tpu.memory_space<vmem>>, vector<8x8xbf16>
    tpu.vector_store %arg17[%c0_52, %c24_53], %82 {strides = array<i32>} : memref<8x32xbf16, #tpu.memory_space<vmem>>, vector<8x8xbf16>,
    %c0_54 = arith.constant 0 : index
    %c0_55 = arith.constant 0 : index
    %84 = vector.load %arg17[%c0_54, %c0_55] : memref<8x32xbf16, #tpu.memory_space<vmem>>, vector<8x32xbf16>
    %c0_56 = arith.constant 0 : index
    %c0_57 = arith.constant 0 : index
    %85 = vector.load %arg11[%c0_56, %c0_57] : memref<32x32xbf16, #tpu.memory_space<vmem>>, vector<32x32xbf16>
    %cst_58 = arith.constant dense<0.000000e+00> : vector<8x32xf32>
    %86 = tpu.matmul %84, %85, %cst_58 {dimension_numbers = #tpu.dot_dimension_numbers<[1], [0], [0], [1], [0, 0, 1, 1], [], []>} : vector<8x32xbf16>, vector<32x32xbf16>, vector<8x32xf32> -> vector<8x32xf32>
    %c0_59 = arith.constant 0 : index
    %c0_60 = arith.constant 0 : index
    %87 = vector.load %arg12[%c0_59, %c0_60] : memref<1x32xf32, #tpu.memory_space<vmem>>, vector<1x32xf32>
    %88 = vector.broadcast %87 : vector<1x32xf32> to vector<8x32xf32>
    %89 = arith.addf %86, %88 : vector<8x32xf32>
    %c0_61 = arith.constant 0 : index
    %c0_62 = arith.constant 0 : index
    %c0_63 = arith.constant 0 : index
    %90 = vector.load %arg13[%c0_61, %c0_62, %c0_63] : memref<1x8x32xf32, #tpu.memory_space<vmem>>, vector<1x8x32xf32>
    %91 = vector.shape_cast %90 : vector<1x8x32xf32> to vector<8x32xf32>
    %92 = vector.shape_cast %89 : vector<8x32xf32> to vector<1x8x32xf32>
    tpu.vector_store %arg13[%c0_61, %c0_62, %c0_63], %92 {strides = array<i32>} : memref<1x8x32xf32, #tpu.memory_space<vmem>>, vector<1x8x32xf32>,
    return
  }
  func.func @transform_0(%arg0: i32, %arg1: i32) -> (i32, i32, i32) {
    %c0_i32 = arith.constant 0 : i32
    %c0_i32_0 = arith.constant 0 : i32
    return %arg0, %arg1, %c0_i32 : i32, i32, i32
  }
  func.func @transform_1(%arg0: i32, %arg1: i32) -> (i32, i32, i32) {
    %c0_i32 = arith.constant 0 : i32
    %c0_i32_0 = arith.constant 0 : i32
    %c0_i32_1 = arith.constant 0 : i32
    return %arg0, %c0_i32, %c0_i32_0 : i32, i32, i32
  }
  func.func @transform_2(%arg0: i32, %arg1: i32) -> (i32, i32, i32) {
    %c0_i32 = arith.constant 0 : i32
    %c0_i32_0 = arith.constant 0 : i32
    %c0_i32_1 = arith.constant 0 : i32
    return %arg0, %c0_i32, %c0_i32_0 : i32, i32, i32
  }
  func.func @transform_3(%arg0: i32, %arg1: i32) -> (i32, i32) {
    %c0_i32 = arith.constant 0 : i32
    %c0_i32_0 = arith.constant 0 : i32
    %c0_i32_1 = arith.constant 0 : i32
    return %c0_i32, %c0_i32_0 : i32, i32
  }
  func.func @transform_4(%arg0: i32, %arg1: i32) -> (i32, i32) {
    %c0_i32 = arith.constant 0 : i32
    %c0_i32_0 = arith.constant 0 : i32
    %c0_i32_1 = arith.constant 0 : i32
    return %c0_i32, %c0_i32_0 : i32, i32
  }
  func.func @transform_5(%arg0: i32, %arg1: i32) -> (i32, i32) {
    %c0_i32 = arith.constant 0 : i32
    %c0_i32_0 = arith.constant 0 : i32
    %c0_i32_1 = arith.constant 0 : i32
    return %c0_i32, %c0_i32_0 : i32, i32
  }
  func.func @transform_6(%arg0: i32, %arg1: i32) -> (i32, i32) {
    %c0_i32 = arith.constant 0 : i32
    %c0_i32_0 = arith.constant 0 : i32
    %c0_i32_1 = arith.constant 0 : i32
    return %c0_i32, %c0_i32_0 : i32, i32
  }
  func.func @transform_7(%arg0: i32, %arg1: i32) -> (i32, i32) {
    %c0_i32 = arith.constant 0 : i32
    %c0_i32_0 = arith.constant 0 : i32
    %c0_i32_1 = arith.constant 0 : i32
    return %c0_i32, %c0_i32_0 : i32, i32
  }
  func.func @transform_8(%arg0: i32, %arg1: i32) -> (i32, i32) {
    %c0_i32 = arith.constant 0 : i32
    %c0_i32_0 = arith.constant 0 : i32
    %c0_i32_1 = arith.constant 0 : i32
    return %c0_i32, %c0_i32_0 : i32, i32
  }
  func.func @transform_9(%arg0: i32, %arg1: i32) -> (i32, i32) {
    %c0_i32 = arith.constant 0 : i32
    %c0_i32_0 = arith.constant 0 : i32
    %c0_i32_1 = arith.constant 0 : i32
    return %c0_i32, %c0_i32_0 : i32, i32
  }
  func.func @transform_10(%arg0: i32, %arg1: i32) -> (i32, i32) {
    %c0_i32 = arith.constant 0 : i32
    %c0_i32_0 = arith.constant 0 : i32
    %c0_i32_1 = arith.constant 0 : i32
    return %c0_i32, %c0_i32_0 : i32, i32
  }
  func.func @transform_11(%arg0: i32, %arg1: i32) -> (i32, i32, i32) {
    %c0_i32 = arith.constant 0 : i32
    %c0_i32_0 = arith.constant 0 : i32
    return %arg0, %arg1, %c0_i32 : i32, i32, i32
  }
}

</mosaic_0001>

<bundles_post_ra>
// kernel: tpu_custom_call.1
= control target key start
LH: loop header
LB: loop body
LE: loop exit
PB: predicated region body
PF: predicated region fallthrough
CT: control target
= control target key end

     0   :  { %s2706_s0 = inlined_call_operand.hbm [shape: bf16[2,8,32], index: 0, kind: input, shape index: {}]   ;;  %s2707_s1 = inlined_call_operand.hbm [shape: bf16[2,8,32], index: 1, kind: input, shape index: {}]   ;;  %s2708_s2 = inlined_call_operand.hbm [shape: bf16[2,8,32], index: 2, kind: input, shape index: {}]   ;;  %s2709_s3 = inlined_call_operand.hbm [shape: bf16[32,32], index: 3, kind: input, shape index: {}]   ;;  %s2710_s4 = inlined_call_operand.hbm [shape: bf16[32,32], index: 4, kind: input, shape index: {}]   ;;  %s2711_s5 = inlined_call_operand.hbm [shape: bf16[32,32], index: 5, kind: input, shape index: {}]   ;;  %s2712_s6 = inlined_call_operand.hbm [shape: f32[1,32], index: 6, kind: input, shape index: {}]   ;;  %s2713_s7 = inlined_call_operand.hbm [shape: f32[1,32], index: 7, kind: input, shape index: {}]   ;;  %s2714_s8 = inlined_call_operand.hbm [shape: f32[1,32], index: 8, kind: input, shape index: {}]   ;;  %s2715_s9 = inlined_call_operand.vmem [shape: bf16[32,32], index: 9, kind: input, shape index: {}]   ;;  %s2716_s10 = inlined_call_operand.vmem [shape: f32[1,32], index: 10, kind: input, shape index: {}]   ;;  %s2717_s11 = inlined_call_operand.hbm [shape: f32[2,8,32], index: 11, kind: output, shape index: {}]  }
   0x1   :  { %2735 = sst [smem:[#allocation34_spill]] %s2709_s3 }
   0x2   :  { %2736 = sst [smem:[#allocation35_spill]] %s2711_s5 }
   0x3   :  { %2737 = sst [smem:[#allocation36_spill]] %s2713_s7 }
   0x4   :  { %2738 = sst [smem:[#allocation37_spill]] %s2716_s10 }
   0x5   :  { %2739 = sst [smem:[#allocation38_spill]] %s2717_s11 }
   0x6   :  { %16 = vsyncpa [#allocation7], 0 }
   0x7   :  { %18 = vsyncpa [#allocation7 + $0x1], 0 }
   0x8   :  { %19 = vsyncpa [#allocation10], 0 }
   0x9   :  { %21 = vsyncpa [#allocation10 + $0x1], 0 }
   0xa   :  { %22 = vsyncpa [#allocation13], 0 }
   0xb   :  { %23 = vsyncpa [#allocation16], 0 }
   0xc   :  { %24 = vsyncpa [#allocation19], 0 }
   0xd   :  { %25 = vsyncpa [#allocation8], 0 }
   0xe   :  { %27 = vsyncpa [#allocation8 + $0x1], 0  ;;  %s2327_s17 = smov 0   ;;  %s2329_s18 = smov 0  }
   0xf   :  { %s2331_s19 = smov 0   ;;  %s2333_s20 = smov 0  }
  0x10   :  { %s2335_s21 = smov 0   ;;  %s2337_s22 = smov 0  }
  0x11 LB: > { %2740 = sst [smem:[#allocation28_spill]] %s2225_s17  ;;  %s2358_s23 = sadd.s32 4294967295, %s2245_s22   ;;  %s2245_s22 = sphi %s2337_s22, %s33_s22   ;;  %s2241_s21 = sphi %s2335_s21, %s2781_s21   ;;  %s2237_s20 = sphi %s2333_s20, %s2780_s20   ;;  %s2233_s19 = sphi %s2331_s19, %s2784_s19   ;;  %s2229_s18 = sphi %s2329_s18, %s2783_s18   ;;  %s2225_s17 = sphi %s2327_s17, %s2782_s17  }
  0x12   : > { %2741 = sst [smem:[#allocation29_spill]] %s2241_s21  ;;  %p1557_p0 = scmp.ge.s32.totalorder %s2245_s22, 1 }
  0x13   : > { %2742 = sst [smem:[#allocation30_spill]] %s2245_s22  ;;  %p2728_p1 = scmp.eq.s32.totalorder %s2358_s23, 0 }
  0x14   : > { %p326_p2 = scmp.lt.s32.totalorder %s2245_s22, 3  ;;  %s2247_s25 = smov [#allocation12]  }
  0x15   : > { %s338_s26 = sshll.u32 %s2247_s25, 4  ;;  %s2248_s28 = smov [#allocation15]   ;;  %s339_s26 = int_to_ptr.vmem [resolvable:$true] %s338_s26 }
  0x16   : > { %p2363_p3 = pnand %p1557_p0, %p326_p2  ;;  %s364_s29 = sshll.u32 %s2248_s28, 4  ;;  %s365_s29 = int_to_ptr.vmem [resolvable:$true] %s364_s29 }
  0x17   : > { %s2249_s30 = smov [#allocation18]   ;;  %s1920_s14 = scalar_lea.vmem %s339_s26, 256 }
  0x18   : > { %s2743_s24 = scalar_select %p2363_p3, 1, 0 }
  0x19   : > { %p1765_p4 = pneg %p2363_p3  ;;  %s389_s12 = sshll.u32 %s2249_s30, 4  ;;  %s390_s12 = int_to_ptr.vmem [resolvable:$true] %s389_s12 }
  0x1a   : > { %p1921_p8 = scmp.ne.s32.totalorder %s339_s26, %s1920_s14  ;;  %p1928_p11 = scmp.lt.s32.totalorder %s339_s26, %s339_s26 }
  0x1b   : > { %p2372_p6 = pnand %p1765_p4, %p2728_p1  ;;  %p1929_p12 = scmp.lt.s32.totalorder %s1920_s14, %s1920_s14 }
  0x1d   : > { %s2744_s27 = scalar_select %p2372_p6, 1, 0 }
  0x1e   : > { %p2378_p7 = pneg %p2372_p6  ;;  %p1930_p13 = por %p1929_p12, %p1928_p11 }
  0x20   : > { %p1923_p9 = pnand %p1921_p8, %p2378_p7 }
  0x22   : > { %p1924_p10 = pneg %p1923_p9 }
  0x24   : > { %p1931_p0 = pnand %p1930_p13, %p1924_p10 }
  0x26   : > { %1934 = shalt.err (!%p1931_p0)
}
  0x27   : > { %s2719_s15 = smov 64   ;;  %s2720_s16 = smov 4  }
  0x28   : > { %s2746_s3 = sld [smem:[#allocation34_spill]]  ;;  %s1946_s30 = scalar_lea.vmem %s365_s29, 256 }
  0x29   : > { %p1947_p2 = scmp.ne.s32.totalorder %s365_s29, %s1946_s30  ;;  %p1954_p9 = scmp.lt.s32.totalorder %s365_s29, %s365_s29 }
  0x2a   : > { %p1955_p10 = scmp.lt.s32.totalorder %s1946_s30, %s1946_s30 }
  0x2b   : > { %p1949_p4 = pnand %p1947_p2, %p2378_p7 }
  0x2c   : > { %p1956_p11 = por %p1955_p10, %p1954_p9 }
  0x2d   : > { %p1950_p8 = pneg %p1949_p4 }
  0x2e   : > { %1768 = dma.hbm_to_vmem [thread:$0]  (!%p2372_p6), %s2746_s3, 256, %s339_s26, [#allocation13], %s2719_s15, %s2719_s15, %s2720_s16  }
  0x2f   : > { %p1957_p12 = pnand %p1956_p11, %p1950_p8 }
  0x31   : > { %1960 = shalt.err (!%p1957_p12)
}
  0x32   : > { %s2747_s5 = sld [smem:[#allocation35_spill]]  ;;  %s1972_s26 = scalar_lea.vmem %s390_s12, 16 }
  0x33   : > { %p1973_p13 = scmp.ne.s32.totalorder %s390_s12, %s1972_s26  ;;  %s1979_s25 = scalar_lea.vmem %s390_s12, 32 }
  0x34   : > { %p1980_p4 = scmp.lt.s32.totalorder %s390_s12, %s390_s12  ;;  %p1981_p8 = scmp.lt.s32.totalorder %s1979_s25, %s1972_s26 }
  0x35   : > { %p1975_p0 = pnand %p1973_p13, %p2378_p7 }
  0x36   : > { %p1982_p9 = por %p1981_p8, %p1980_p4 }
  0x37   : > { %p1976_p2 = pneg %p1975_p0 }
  0x38   : > { %1774 = dma.hbm_to_vmem [thread:$0]  (!%p2372_p6), %s2747_s5, 256, %s365_s29, [#allocation16], %s2719_s15, %s2719_s15, %s2720_s16  }
  0x39   : > { %p1983_p10 = pnand %p1982_p9, %p1976_p2 }
  0x3b   : > { %1986 = shalt.err (!%p1983_p10)
}
  0x3c   : > { %s2748_s7 = sld [smem:[#allocation36_spill]]  ;;  %s1556_s11 = sadd.s32 4294967294, %s2245_s22  }
  0x3d   : > { %s45_s29 = sadd.s32 1, %s2241_s21  ;;  %s54_s14 = sadd.s32 1, %s2233_s19 }
  0x3e   : > { %p47_p11 = scmp.ge.s32.totalorder %s45_s29, 2  ;;  %p61_p12 = scmp.ne.s32.totalorder %s2233_s19, %s2229_s18 }
  0x3f   : > { %p62_p13 = scmp.eq.s32.totalorder %s2245_s22, 0  ;;  %p67_p0 = scmp.ne.s32.totalorder %s2229_s18, %s2225_s17 }
  0x40   : > { %s2786_s29 = smov (%p47_p11, %s45_s29), 0  ;;  %p313_p8 = scmp.eq.s32.totalorder %s2358_s23, 1 }
  0x41   : > { %2749 = sst [smem:[#allocation31_spill]] %s2786_s29  ;;  %p2419_p2 = por %p62_p13, %p61_p12 }
  0x42   : > { %1780 = dma.hbm_to_vmem [thread:$0]  (!%p2372_p6), %s2748_s7, 16, %s390_s12, [#allocation19]  }
  0x43   : > { %p2425_p4 = por %p2728_p1, %p67_p0  ;;  %s49_s25 = ssub.s32 %s2241_s21, %s2786_s29 }
  0x44   : > { %p52_p9 = scmp.eq.s32.totalorder %s49_s25, 0  ;;  %p319_p10 = scmp.eq.s32.totalorder %s1556_s11, 1 }
  0x45   : > { %s2751_s12 = scalar_select %p2425_p4, 1, 0 }
  0x46   : > { %p2432_p5 = por %p313_p8, %p61_p12  ;;  %p1804_p11 = scmp.lt.s32.totalorder %s2245_s22, 2 }
  0x47   : > { %s2438_s30 = scalar_select %p52_p9, %s2233_s19, %s54_s14  }
  0x48   : > { %s2752_s28 = scalar_select %p2432_p5, 1, 0 }
  0x49   : > { %2753 = sst [smem:[#allocation32_spill]] %s2438_s30  ;;  %p2440_p13 = por %p319_p10, %p67_p0 }
  0x4a   : > { %s2723_s16 = sand.u32 1, %s2233_s19   ;;  %s2450_s5 = sshll.u32 %s2241_s21, 6 }
  0x4b   : > { %s2754_s15 = scalar_select %p2440_p13, 1, 0 }
  0x4c   : > { %s2447_s3 = sshll.u32 %s2723_s16, 2  ;;  %p2454_p12 = pnand %p1804_p11, %p2419_p2 }
  0x4d   : > { %2755 = sst [smem:[#allocation33_spill]] %s2754_s15  ;;  %s436_s14 = sand.u32 1, %s2245_s22  }
  0x4e   : > { %s445_s29 = scalar_lea.hbm %s2707_s1, %s2450_s5  ;;  %s440_s30 = scalar_lea.vmem [#allocation9], %s2447_s3 }
  0x4f   : > { %s447_s15 = sshll.u32 %s440_s30, 4  ;;  %s2252_s16 = smov [#allocation14]   ;;  %s448_s15 = int_to_ptr.vmem [resolvable:$true] %s447_s15 }
  0x50   : > { %s351_s17 = sshll.u32 %s2252_s16, 4  ;;  %s2464_s21 = scalar_lea.sflag [#allocation10], %s436_s14  ;;  %s352_s17 = int_to_ptr.vmem [resolvable:$true] %s351_s17 }
  0x51   : > { %p2730_p0 = pneg %p2454_p12  ;;  %s2000_s26 = scalar_lea.vmem %s448_s15, 64 }
  0x52   : > { %p2001_p2 = scmp.ne.s32.totalorder %s448_s15, %s2000_s26  ;;  %s2253_s22 = smov [#allocation9]  }
  0x53   : > { %s2005_s10 = sshll.u32 %s2253_s22, 4  ;;  %s2006_s10 = int_to_ptr.vmem [resolvable:$false] %s2005_s10 }
  0x54   : > { %p2003_p8 = pnand %p2001_p2, %p2730_p0  ;;  %s2007_s7 = scalar_lea.vmem %s2006_s10, 128 }
  0x55   : > { %p2008_p10 = scmp.lt.s32.totalorder %s448_s15, %s2006_s10  ;;  %p2009_p11 = scmp.lt.s32.totalorder %s2007_s7, %s2000_s26 }
  0x56   : > { %p2004_p9 = pneg %p2003_p8 }
  0x57   : > { %p2010_p1 = por %p2009_p11, %p2008_p10 }
  0x59   : > { %p2011_p13 = pnand %p2010_p1, %p2004_p9 }
  0x5b   : > { %2014 = shalt.err (!%p2011_p13)
}
  0x5c   : > { %1790 = dma.hbm_to_vmem [thread:$0]  (!%p2454_p12), %s445_s29, 64, %s448_s15, %s2464_s21  }
  0x5d   : > { %s2026_s16 = scalar_lea.vmem %s352_s17, 256  ;;  %p2034_p0 = scmp.lt.s32.totalorder %s352_s17, %s352_s17 }
  0x5e   : > { %p2027_p5 = scmp.ne.s32.totalorder %s352_s17, %s2026_s16  ;;  %p2035_p4 = scmp.lt.s32.totalorder %s2026_s16, %s2026_s16 }
  0x60   : > { %p2029_p2 = pnand %p2027_p5, %p2378_p7  ;;  %p2036_p3 = por %p2035_p4, %p2034_p0 }
  0x62   : > { %p2030_p8 = pneg %p2029_p2 }
  0x64   : > { %p2037_p6 = pnand %p2036_p3, %p2030_p8 }
  0x66   : > { %2040 = shalt.err (!%p2037_p6)
}
  0x67   : > { %p2757_p10 = scmp.ne.s32.totalorder %s2744_s27, 0  ;;  %s2758_s10 = smov 4  }
  0x68   : > { %s2759_s22 = smov 64   ;;  %s2254_s15 = smov [#allocation17]  }
  0x69   : > { %1771 = dma.hbm_to_vmem [thread:$0]  (!%p2757_p10), %s2710_s4, 256, %s352_s17, [#allocation13], %s2759_s22, %s2759_s22, %s2758_s10  }
  0x6a   : > { %s378_s29 = sshll.u32 %s2254_s15, 4  ;;  %s2255_s25 = smov [#allocation20]   ;;  %s379_s29 = int_to_ptr.vmem [resolvable:$true] %s378_s29 }
  0x6b   : > { %s400_s26 = sshll.u32 %s2255_s25, 4  ;;  %s2052_s7 = scalar_lea.vmem %s379_s29, 16  ;;  %s401_s26 = int_to_ptr.vmem [resolvable:$true] %s400_s26 }
  0x6c   : > { %p2053_p1 = scmp.ne.s32.totalorder %s379_s29, %s2052_s7  ;;  %s2059_s16 = scalar_lea.vmem %s379_s29, 32 }
  0x6d   : > { %p2060_p6 = scmp.lt.s32.totalorder %s379_s29, %s379_s29  ;;  %p2061_p4 = scmp.lt.s32.totalorder %s2059_s16, %s2052_s7 }
  0x6e   : > { %p2055_p3 = pnand %p2053_p1, %p2378_p7 }
  0x6f   : > { %p2062_p13 = por %p2061_p4, %p2060_p6 }
  0x70   : > { %p2056_p5 = pneg %p2055_p3 }
  0x72   : > { %p2063_p0 = pnand %p2062_p13, %p2056_p5 }
  0x74   : > { %2066 = shalt.err (!%p2063_p0)
}
  0x75   : > { %1777 = dma.hbm_to_vmem [thread:$0]  (!%p2757_p10), %s2712_s6, 16, %s379_s29, [#allocation16]  }
  0x76   : > { %s2078_s10 = scalar_lea.vmem %s401_s26, 16  ;;  %s2085_s22 = scalar_lea.vmem %s401_s26, 32 }
  0x77   : > { %p2079_p9 = scmp.ne.s32.totalorder %s401_s26, %s2078_s10  ;;  %p2086_p8 = scmp.lt.s32.totalorder %s401_s26, %s401_s26 }
  0x78   : > { %p2087_p1 = scmp.lt.s32.totalorder %s2085_s22, %s2078_s10 }
  0x79   : > { %p2081_p11 = pnand %p2079_p9, %p2378_p7 }
  0x7a   : > { %p2088_p3 = por %p2087_p1, %p2086_p8 }
  0x7b   : > { %p2082_p2 = pneg %p2081_p11 }
  0x7d   : > { %p2089_p6 = pnand %p2088_p3, %p2082_p2 }
  0x7f   : > { %2092 = shalt.err (!%p2089_p6)
}
  0x80   : > { %1783 = dma.hbm_to_vmem [thread:$0]  (!%p2757_p10), %s2714_s8, 16, %s401_s26, [#allocation19]  }
  0x81   : > { %s427_s25 = scalar_lea.hbm %s2706_s0, %s2450_s5  ;;  %s421_s7 = scalar_lea.vmem [#allocation6], %s2447_s3 }
  0x82   : > { %s429_s16 = sshll.u32 %s421_s7, 4  ;;  %s463_s27 = scalar_lea.hbm %s2708_s2, %s2450_s5  ;;  %s430_s16 = int_to_ptr.vmem [resolvable:$true] %s429_s16 }
  0x83   : > { %s2760_s10 = sand.u32 1, %s2233_s19   ;;  %s2106_s14 = scalar_lea.vmem %s430_s16, 64 }
  0x84   : > { %s418_s22 = scalar_lea.sflag [#allocation7], %s2760_s10  ;;  %p2107_p7 = scmp.ne.s32.totalorder %s430_s16, %s2106_s14 }
  0x85   : > { %p2761_p5 = pneg %p2454_p12  ;;  %s2256_s26 = smov [#allocation6]  }
  0x86   : > { %s2111_s15 = sshll.u32 %s2256_s26, 4  ;;  %s2112_s15 = int_to_ptr.vmem [resolvable:$false] %s2111_s15 }
  0x87   : > { %p2109_p4 = pnand %p2107_p7, %p2761_p5  ;;  %s2113_s13 = scalar_lea.vmem %s2112_s15, 128 }
  0x88   : > { %p2114_p10 = scmp.lt.s32.totalorder %s430_s16, %s2112_s15  ;;  %p2115_p0 = scmp.lt.s32.totalorder %s2113_s13, %s2106_s14 }
  0x89   : > { %p2110_p13 = pneg %p2109_p4 }
  0x8a   : > { %p2116_p9 = por %p2115_p0, %p2114_p10 }
  0x8c   : > { %p2117_p11 = pnand %p2116_p9, %p2110_p13 }
  0x8e   : > { %2120 = shalt.err (!%p2117_p11)
}
  0x8f   : > { %1787 = dma.hbm_to_vmem [thread:$0]  (!%p2454_p12), %s427_s25, 64, %s430_s16, %s418_s22  }
  0x90   : > { %s458_s29 = scalar_lea.vmem [#allocation11], %s2447_s3  ;;  %p2762_p8 = pmov %p2761_p5 }
  0x91   : > { %s465_s7 = sshll.u32 %s458_s29, 4  ;;  %s2257_s17 = smov [#allocation11]   ;;  %s466_s7 = int_to_ptr.vmem [resolvable:$true] %s465_s7 }
  0x92   : > { %s2134_s30 = scalar_lea.vmem %s466_s7, 64  ;;  %s2139_s10 = sshll.u32 %s2257_s17, 4  ;;  %s2140_s10 = int_to_ptr.vmem [resolvable:$false] %s2139_s10 }
  0x93   : > { %p2135_p2 = scmp.ne.s32.totalorder %s466_s7, %s2134_s30  ;;  %s2141_s14 = scalar_lea.vmem %s2140_s10, 128 }
  0x94   : > { %p2142_p6 = scmp.lt.s32.totalorder %s466_s7, %s2140_s10  ;;  %p2143_p7 = scmp.lt.s32.totalorder %s2141_s14, %s2134_s30 }
  0x95   : > { %p2137_p1 = pnand %p2135_p2, %p2762_p8 }
  0x96   : > { %p2144_p5 = por %p2143_p7, %p2142_p6 }
  0x97   : > { %p2138_p3 = pneg %p2137_p1 }
  0x99   : > { %p2145_p4 = pnand %p2144_p5, %p2138_p3 }
  0x9b   : > { %2148 = shalt.err (!%p2145_p4)
}
  0x9c   : > { %1793 = dma.hbm_to_vmem [thread:$0]  (!%p2454_p12), %s463_s27, 64, %s466_s7, %s2464_s21  }
  0x9d   : > { %p2763_p13 = scmp.ne.s32.totalorder %s2743_s24, 0 }
  0x9e   : > { %s2529_s16 = sand.u32 (!%p2763_p13), 1, %s2229_s18   ;;  %p2764_p10 = scmp.ne.s32.totalorder (!%p2763_p13), %s2751_s12, 0 }
  0x9f   : > { %474 = sbr.rel (%p2763_p13) target bundleno = 1568 (0x620), region = 64  ;;  %s2532_s22 = sshll.u32 (!%p2763_p13), %s2529_s16, 2 }
  0xa0   : > { %s477_s11 = scalar_lea.sflag (!%p2763_p13), [#allocation7], %s2529_s16  ;;  %s480_s26 = scalar_lea.vmem (!%p2763_p13), [#allocation6], %s2532_s22 }
  0xa4   : > { %2200 = dma.done.wait (%p2764_p10), %s477_s11, 64  }
  0xa5   : > { %2202 = vsyncadd (%p2764_p10), %s477_s11, 4294967232  ;;  %s485_s5 = sand.u32 1, %s2358_s23   ;;  %s489_s24 = scalar_lea.vmem [#allocation9], %s2532_s22 }
  0xa6   : > { %s486_s21 = scalar_lea.sflag [#allocation10], %s485_s5 }
  0xa7   : > { %2204 = dma.done.wait (%p2764_p10), %s486_s21, 128  }
  0xa8   : > { %2206 = vsyncadd (%p2764_p10), %s486_s21, 4294967168  ;;  %s498_s27 = scalar_lea.vmem [#allocation11], %s2532_s22  ;;  %p2765_p12 = scmp.eq.s32.totalorder %s2358_s23, 0 }
  0xaa   : > { %2208 = dma.done.wait (%p2765_p12), [#allocation13], 512   ;;  %p2766_p0 = pmov %p2765_p12 }
  0xac   : > { %2210 = vsyncadd (%p2766_p0), [#allocation13], 4294966784  ;;  %p2767_p9 = pmov %p2766_p0 }
  0xad   : > { %p2768_p11 = pmov %p2766_p0 }
  0xae   : > { %2212 = dma.done.wait (%p2767_p9), [#allocation16], 272  }
  0xaf   : > { %2214 = vsyncadd (%p2768_p11), [#allocation16], 4294967024  ;;  %p2769_p2 = pmov %p2766_p0 }
  0xb0   : > { %p2770_p8 = pmov %p2766_p0 }
  0xb1   : > { %2216 = dma.done.wait (%p2769_p2), [#allocation19], 32  }
  0xb2   : > { %2218 = vsyncadd (%p2770_p8), [#allocation19], 4294967264  ;;  %v2258_v0 = vmov 0.0   ;;  %vm2259_vm0 = vmmov 0   ;;  %v1876_v1 = vld [vmem:[#allocation14 + $0x8] sm:$0xff]   ;;  %v1877_v2 = vld [vmem:[#allocation14] sm:$0xff]  }
  0xb3   : > { %1653 = vmatprep.subr.bf16.mxu0 %v2258_v0  ;;  %1657 = vmatprep.mubr.msk.bf16.mxu0 %vm2259_vm0, %v2258_v0  ;;  %v576_v3 = vld [vmem:[%s489_s24] sm:$0xf]  ;;  %vm600_vm1 = vcmask 261120   ;;  %v1878_v4 = vld [vmem:[#allocation12 + $0x8] sm:$0xff]   ;;  %v1879_v5 = vld [vmem:[#allocation12] sm:$0xff]   ;;  %vm712_vm2 = vcmask 257024  }
  0xb4   : > { %1661 = vmatprep.subr.bf16.mxu1 %v2258_v0  ;;  %1665 = vmatprep.mubr.msk.bf16.mxu1 %vm2259_vm0, %v2258_v0  ;;  %v716_v6 = vld [vmem:[%s480_s26] sm:$0xf]  ;;  %v1881_v8 = vld [vmem:[#allocation15] sm:$0xff]   ;;  %v644_v9 = vld [vmem:[%s498_s27] sm:$0xf]  ;;  %vm790_vm3 = vcmask 64512  }
  0xb5   : > { %1654 = vmatpush3.bf16.msra.mxu0 %v1876_v1  ;;  %v1880_v7 = vld [vmem:[#allocation15 + $0x8] sm:$0xff]   ;;  %v1582_v10 = vld [vmem:[#allocation18] ss:$0 sm:$0xff]  ;;  %v1590_v17 = vld [vmem:[#allocation17] ss:$0 sm:$0xff]  ;;  %s2260_s23 = smov 112  }
  0xb6   : > { %1655 = vmatprep.subr.bf16.mxu0 %v2258_v0  ;;  %1662 = vmatpush3.bf16.msra.mxu1 %v1880_v7  ;;  %s2261_s12 = smov 120   ;;  %s2262_s15 = smov 104   ;;  %v1586_v33 = vld [vmem:[#allocation20] ss:$0 sm:$0xff]  ;;  %vm852_vm4 = vcmask 1043456   ;;  %vm897_vm5 = vcmask 60416  }
  0xb7   : > { %1663 = vmatprep.subr.bf16.mxu1 %v2258_v0  ;;  %s2263_s13 = smov 8   ;;  %s2264_s10 = smov 16   ;;  %vm1028_vm6 = vcmask 126016   ;;  %vm1159_vm7 = vcmask 191616   ;;  %vm1290_vm8 = vcmask 257216  }
  0xb8   : > { %s2265_s14 = smov 24   ;;  %s1581_s3 = sshll.u32 %s2529_s16, 3 }
  0xb9   : > { %1656 = vmatpush3.bf16.msra.mxu0 %v1877_v2  ;;  %s2771_s11 = sld [smem:[#allocation37_spill]]  ;;  %s1619_s26 = sshll.u32 %s2237_s20, 7 }
  0xba   : > { %1669 = vmatprep.subr.bf16.mxu0 %v2258_v0  ;;  %1664 = vmatpush3.bf16.msra.mxu1 %v1881_v8  ;;  %s570_s5 = scalar_lea.vmem [#allocation21], %s1581_s3  ;;  %p2773_p3 = scmp.ne.s32.totalorder %s2752_s28, 0 }
  0xbb   : > { %1677 = vmatprep.subr.bf16.mxu1 %v2258_v0  ;;  %s1375_s21 = sshll.u32 %s570_s5, 4  ;;  %s2659_s21 = int_to_ptr.vmem [resolvable:$true] %s1375_s21 }
  0xbc   : > { %1658 = vmatmul.mubr.msk.bf16.vlgmr.msra.gmra.mxu0 %vm600_vm1, %v576_v3  ;;  %s2149_s20 = scalar_lea.vmem %s2659_s21, 128 }
  0xbd   : > { %1670 = vmatpush3.bf16.msra.mxu0 %v1878_v4  ;;  %1673 = vmatprep.mubr.msk.bf16.mxu0 %vm2259_vm0, %v2258_v0  ;;  %p2150_p1 = scmp.ne.s32.totalorder %s2659_s21, %s2149_s20 }
  0xbe   : > { %1671 = vmatprep.subr.bf16.mxu0 %v2258_v0  ;;  %1666 = vmatmul.mubr.msk.bf16.vlgmr.msra.gmra.mxu1 %vm600_vm1, %v644_v9 }
  0xbf   : > { %1679 = vmatprep.mubr.msk.bf16.mxu1 %vm2259_vm0, %v2258_v0  ;;  %p2151_p6 = pnand %p2150_p1, %p2773_p3 }
  0xc1   : > { %1672 = vmatpush3.bf16.msra.mxu0 %v1879_v5  ;;  %p2152_p7 = pneg %p2151_p6 }
  0xc2   : > { %1683 = vmatprep.subr.bf16.mxu0 %v2258_v0 }
  0xc4   : > { %1674 = vmatmul.mubr.msk.bf16.vlgmr.msra.gmra.mxu0 %vm600_vm1, %v716_v6 }
  0xc5   : > { %1685 = vmatprep.mubr.msk.bf16.mxu0 %vm2259_vm0, %v2258_v0 }
 0x17c   : > { %v638_v11 = vpop.f32.mrf.mxu0 }
 0x17d   : > { %v639_v12 = vadd.f32 %v1582_v10, %v638_v11 }
 0x17e   : > { %v1659_v13 = vpop.f32.mrf.mxu0  ;;  %v705_v34 = vpop.f32.mrf.mxu1 }
 0x17f   : > { %v711_v14 = vpack.c.bf16 %v639_v12, %v639_v12  ;;  %v706_v35 = vadd.f32 %v1586_v33, %v705_v34 }
 0x180   : > { %v641_v15 = vpop.f32.mrf.mxu0  ;;  %v1667_v36 = vpop.f32.mrf.mxu1 }
 0x181   : > { %713 = vst.msk [vmem:[#allocation2] sm:$0xf] %vm712_vm2, %v711_v14  ;;  %v714_v37 = vpack.c.bf16 %v706_v35, %v706_v35 }
 0x182   : > { %v1660_v16 = vpop.f32.mrf.mxu0  ;;  %v708_v38 = vpop.f32.mrf.mxu1 }
 0x183   : > { %715 = vst.msk [vmem:[#allocation3] sm:$0xf] %vm712_vm2, %v714_v37 }
 0x184   : > { %v778_v18 = vpop.f32.mrf.mxu0  ;;  %v1668_v39 = vpop.f32.mrf.mxu1 }
 0x185   : > { %v779_v19 = vadd.f32 %v1590_v17, %v778_v18 }
 0x186   : > { %v1675_v20 = vpop.f32.mrf.mxu0 }
 0x187   : > { %v784_v21 = vpack.c.bf16 %v779_v19, %v779_v19 }
 0x188   : > { %v781_v22 = vpop.f32.mrf.mxu0  ;;  %v788_v23 = vld [vmem:[#allocation2] sm:$0xf] }
 0x189   : > { %v1882_v24 = vld [vmem:[#allocation2] ss:$0 sps:$4 sm:$0xff]   ;;  %786 = vst.msk [vmem:[#allocation4] sm:$0xf] %vm712_vm2, %v784_v21  ;;  %v795_v25 = vsel %vm790_vm3, %v788_v23, 0 }
 0x18a   : > { %v1883_v26 = vld [vmem:[#allocation2] ss:$0 sps:$4 sm:$0xff]   ;;  %v1676_v27 = vpop.f32.mrf.mxu0  ;;  %1678 = vmatpush3.bf16.xpose.msra.mxu1 %v795_v25  ;;  %1041 = vrot.lane.b32.xlu1 %v1882_v24, %s2260_s23  ;;  %v789_v40 = vld [vmem:[#allocation3] sm:$0xf] }
 0x18b   : > { %910 = vrot.lane.b32.xlu0 %v1883_v26, %s2261_s12  ;;  %1689 = vmatprep.subr.bf16.mxu1 %v2258_v0  ;;  %v1887_v32 = vld [vmem:[#allocation2] ss:$0 sps:$4 sm:$0xff]   ;;  %v854_v41 = vsel %vm852_vm4, %v789_v40, 0  ;;  %v1888_v13 = vld [vmem:[#allocation3] ss:$0 sps:$4 sm:$0xff]  }
 0x18c   : > { %1684 = vmatpush3.bf16.msra.mxu0 %v854_v41  ;;  %v1890_v34 = vld [vmem:[#allocation3] ss:$0 sps:$4 sm:$0xff]  }
 0x18d   : > { %1695 = vmatprep.subr.bf16.mxu0 %v2258_v0 }
 0x190   : > { %v787_v28 = vld [vmem:[#allocation4] sm:$0xf] }
 0x191   : > { %v1884_v29 = vld [vmem:[#allocation4] ss:$0 sps:$4 sm:$0xff]   ;;  %1680 = vmatmul.mubr.msk.bf16.vlgmr.msra.gmra.mxu1 %vm790_vm3, %v787_v28 }
 0x192   : > { %v1885_v30 = vld [vmem:[#allocation4] ss:$0 sps:$4 sm:$0xff]   ;;  %1036 = vrot.lane.b32.xlu1 %v1884_v29, %s2260_s23  ;;  %1691 = vmatprep.mubr.msk.bf16.mxu1 %vm2259_vm0, %v2258_v0 }
 0x193   : > { %905 = vrot.lane.b32.xlu0 %v1885_v30, %s2261_s12  ;;  %v1886_v31 = vld [vmem:[#allocation4] ss:$0 sps:$4 sm:$0xff]   ;;  %v1889_v30 = vld [vmem:[#allocation3] ss:$0 sps:$4 sm:$0xff]  }
 0x196   : > { %1167 = vrot.lane.b32.xlu1 %v1886_v31, %s2262_s15 }
 0x197   : > { %1172 = vrot.lane.b32.xlu0 %v1887_v32, %s2262_s15 }
 0x1fc   : > { %v1042_v44 = vpop.permute.xlu1 %1041 }
 0x1fd   : > { %v911_v42 = vpop.permute.xlu0 %910  ;;  %v1047_v46 = vsel %vm790_vm3, %v1042_v44, 0 }
 0x1fe   : > { %v916_v43 = vsel %vm790_vm3, %v911_v42, 0 }
 0x1ff   : > { %1690 = vmatpush3.bf16.xpose.msra.mxu1 %v916_v43 }
 0x200   : > { %1701 = vmatprep.subr.bf16.mxu1 %v2258_v0 }
 0x204   : > { %v1037_v48 = vpop.permute.xlu1 %1036 }
 0x205   : > { %v906_v45 = vpop.permute.xlu0 %905 }
 0x206   : > { %1692 = vmatmul.mubr.msk.bf16.vlgmr.msra.gmra.mxu1 %vm790_vm3, %v906_v45 }
 0x207   : > { %1702 = vmatpush3.bf16.xpose.msra.mxu1 %v1047_v46  ;;  %1703 = vmatprep.mubr.msk.bf16.mxu1 %vm2259_vm0, %v2258_v0 }
 0x208   : > { %1713 = vmatprep.subr.bf16.mxu1 %v2258_v0  ;;  %v1168_v50 = vpop.permute.xlu1 %1167 }
 0x209   : > { %v1173_v47 = vpop.permute.xlu0 %1172 }
 0x20a   : > { %v1178_v49 = vsel %vm790_vm3, %v1173_v47, 0 }
 0x20e   : > { %1704 = vmatmul.mubr.msk.bf16.vlgmr.msra.gmra.mxu1 %vm790_vm3, %v1037_v48 }
 0x20f   : > { %1714 = vmatpush3.bf16.xpose.msra.mxu1 %v1178_v49  ;;  %1715 = vmatprep.mubr.msk.bf16.mxu1 %vm2259_vm0, %v2258_v0 }
 0x210   : > { %1725 = vmatprep.subr.bf16.mxu1 %v2258_v0 }
 0x216   : > { %1716 = vmatmul.mubr.msk.bf16.vlgmr.msra.gmra.mxu1 %vm790_vm3, %v1168_v50 }
 0x217   : > { %1729 = vmatprep.mubr.msk.bf16.mxu1 %vm2259_vm0, %v2258_v0 }
 0x251   : > { %v831_v51 = vpop.f32.mrf.mxu1 }
 0x252   : > { %v837_v52 = vsel %vm790_vm3, %v831_v51, -inf }
 0x253   : > { %838 = vmax.xlane.f32.xlu0 %v837_v52  ;;  %v1681_v53 = vpop.f32.mrf.mxu1 }
 0x255   : > { %v834_v54 = vpop.f32.mrf.mxu1 }
 0x257   : > { %v1682_v55 = vpop.f32.mrf.mxu1 }
 0x2c6   : > { %v952_v56 = vpop.f32.mrf.mxu1 }
 0x2c7   : > { %v958_v57 = vsel %vm790_vm3, %v952_v56, -inf }
 0x2c8   : > { %959 = vmax.xlane.f32.xlu1 %v958_v57  ;;  %v1693_v58 = vpop.f32.mrf.mxu1 }
 0x2ca   : > { %v955_v59 = vpop.f32.mrf.mxu1 }
 0x2cc   : > { %v1694_v60 = vpop.f32.mrf.mxu1 }
 0x2ce   : > { %v1083_v61 = vpop.f32.mrf.mxu1 }
 0x2cf   : > { %v1089_v62 = vsel %vm790_vm3, %v1083_v61, -inf }
 0x2d0   : > { %1090 = vmax.xlane.f32.xlu0 %v1089_v62  ;;  %v1705_v63 = vpop.f32.mrf.mxu1 }
 0x2d1   : > { %v1891_v63 = vld [vmem:[%s2715_s9 + $0x8] sm:$0xff]  }
 0x2d2   : > { %v1086_v1 = vpop.f32.mrf.mxu1  ;;  %1726 = vmatpush3.bf16.msra.mxu1 %v1891_v63 }
 0x2d3   : > { %1727 = vmatprep.subr.bf16.mxu1 %v2258_v0 }
 0x2d4   : > { %v1706_v2 = vpop.f32.mrf.mxu1 }
 0x2d5   : > { %v1892_v2 = vld [vmem:[%s2715_s9] sm:$0xff]  }
 0x2d6   : > { %v1214_v3 = vpop.f32.mrf.mxu1  ;;  %1728 = vmatpush3.bf16.msra.mxu1 %v1892_v2 }
 0x2d7   : > { %v1220_v4 = vsel %vm790_vm3, %v1214_v3, -inf }
 0x2d8   : > { %1221 = vmax.xlane.f32.xlu0 %v1220_v4  ;;  %v1717_v5 = vpop.f32.mrf.mxu1 }
 0x2da   : > { %v1217_v6 = vpop.f32.mrf.mxu1 }
 0x2dc   : > { %v839_v7 = vpop.xlane.xlu0 %838  ;;  %v1718_v8 = vpop.f32.mrf.mxu1 }
 0x2dd   : > { %v840_v9 = vsub.f32 %v831_v51, %v839_v7 }
 0x2df   : > { %v841_v10 = vmul.f32 1.442695, %v840_v9 }
 0x2e1   : > { %1893 = vpow2.f32 %v841_v10 }
 0x2ee   : > { %v1894_v11 = vpop.eup %1893 }
 0x2ef   : > { %v843_v12 = vsel %vm790_vm3, %v1894_v11, 0.0 }
 0x2f0   : > { %844 = vadd.xlane.f32.xlu1 %v843_v12 }
 0x301   : > { %973 = vrot.lane.b32.xlu1 %v1888_v13, %s2261_s12 }
 0x351   : > { %v960_v14 = vpop.xlane.xlu1 %959 }
 0x352   : > { %v961_v15 = vsub.f32 %v952_v56, %v960_v14 }
 0x354   : > { %v962_v16 = vmul.f32 1.442695, %v961_v15  ;;  %v1614_v15 = vld [vmem:[%s2771_s11] ss:$0 sm:$0xff] }
 0x356   : > { %1895 = vpow2.f32 %v962_v16 }
 0x359   : > { %v1091_v17 = vpop.xlane.xlu0 %1090 }
 0x35a   : > { %v1092_v18 = vsub.f32 %v1083_v61, %v1091_v17 }
 0x35c   : > { %v1093_v19 = vmul.f32 1.442695, %v1092_v18 }
 0x35e   : > { %1897 = vpow2.f32 %v1093_v19 }
 0x361   : > { %v1222_v20 = vpop.xlane.xlu0 %1221 }
 0x362   : > { %v1223_v21 = vsub.f32 %v1214_v3, %v1222_v20 }
 0x363   : > { %v1896_v22 = vpop.eup %1895 }
 0x364   : > { %v1224_v23 = vmul.f32 1.442695, %v1223_v21  ;;  %v964_v24 = vsel %vm790_vm3, %v1896_v22, 0.0 }
 0x365   : > { %965 = vadd.xlane.f32.xlu0 %v964_v24 }
 0x366   : > { %1899 = vpow2.f32 %v1224_v23 }
 0x36b   : > { %v1898_v25 = vpop.eup %1897 }
 0x36c   : > { %v1095_v26 = vsel %vm790_vm3, %v1898_v25, 0.0 }
 0x36d   : > { %1096 = vadd.xlane.f32.xlu1 %v1095_v26 }
 0x373   : > { %v1900_v27 = vpop.eup %1899 }
 0x374   : > { %v1226_v28 = vsel %vm790_vm3, %v1900_v27, 0.0 }
 0x375   : > { %1227 = vadd.xlane.f32.xlu0 %v1226_v28 }
 0x379   : > { %v845_v29 = vpop.xlane.xlu1 %844 }
 0x37a   : > { %1901 = vrcp.f32 %v845_v29 }
 0x37d   : > { %v974_v33 = vpop.permute.xlu1 %973 }
 0x37e   : > { %1235 = vrot.lane.b32.xlu1 %v1889_v30, %s2262_s15  ;;  %v979_v36 = vsel %vm852_vm4, %v974_v33, 0  ;;  %s1361_s15 = scalar_lea.sflag [#allocation8], %s2529_s16 }
 0x387   : > { %v1902_v31 = vpop.eup %1901 }
 0x388   : > { %v847_v32 = vmul.f32 %v1902_v31, %v1894_v11 }
 0x38a   : > { %v848_v35 = vpack.c.bf16 %v847_v32, %v847_v32 }
 0x38b   : > { %1104 = vrot.lane.b32.xlu0 %v1890_v34, %s2260_s23  ;;  %s2772_s23 = sld [smem:[#allocation38_spill]] }
 0x38c   : > { %1686 = vmatmul.mubr.msk.bf16.vlgmr.msra.gmra.mxu0 %vm790_vm3, %v848_v35 }
 0x38d   : > { %1696 = vmatpush3.bf16.msra.mxu0 %v979_v36  ;;  %1697 = vmatprep.mubr.msk.bf16.mxu0 %vm2259_vm0, %v2258_v0 }
 0x38e   : > { %1707 = vmatprep.subr.bf16.mxu0 %v2258_v0 }
 0x391   : > { %s2657_s12 = scalar_lea.hbm %s2772_s23, %s1619_s26 }
 0x3ee   : > { %v966_v37 = vpop.xlane.xlu0 %965 }
 0x3ef   : > { %1903 = vrcp.f32 %v966_v37 }
 0x3f6   : > { %v1097_v38 = vpop.xlane.xlu1 %1096 }
 0x3f7   : > { %1905 = vrcp.f32 %v1097_v38 }
 0x3fa   : > { %v1236_v47 = vpop.permute.xlu1 %1235 }
 0x3fb   : > { %v1241_v49 = vsel %vm852_vm4, %v1236_v47, 0 }
 0x3fc   : > { %v1904_v39 = vpop.eup %1903 }
 0x3fd   : > { %v968_v40 = vmul.f32 %v1904_v39, %v1896_v22 }
 0x3fe   : > { %v1228_v41 = vpop.xlane.xlu0 %1227 }
 0x3ff   : > { %1907 = vrcp.f32 %v1228_v41  ;;  %v969_v42 = vpack.c.bf16 %v968_v40, %v968_v40 }
 0x401   : > { %1698 = vmatmul.mubr.msk.bf16.vlgmr.msra.gmra.mxu0 %vm790_vm3, %v969_v42 }
 0x402   : > { %v1105_v43 = vpop.permute.xlu0 %1104  ;;  %1709 = vmatprep.mubr.msk.bf16.mxu0 %vm2259_vm0, %v2258_v0 }
 0x403   : > { %v1110_v44 = vsel %vm852_vm4, %v1105_v43, 0 }
 0x404   : > { %v1906_v45 = vpop.eup %1905  ;;  %1708 = vmatpush3.bf16.msra.mxu0 %v1110_v44 }
 0x405   : > { %1719 = vmatprep.subr.bf16.mxu0 %v2258_v0  ;;  %v1099_v46 = vmul.f32 %v1906_v45, %v1898_v25 }
 0x407   : > { %v1100_v48 = vpack.c.bf16 %v1099_v46, %v1099_v46 }
 0x409   : > { %1710 = vmatmul.mubr.msk.bf16.vlgmr.msra.gmra.mxu0 %vm790_vm3, %v1100_v48 }
 0x40a   : > { %1720 = vmatpush3.bf16.msra.mxu0 %v1241_v49  ;;  %1721 = vmatprep.mubr.msk.bf16.mxu0 %vm2259_vm0, %v2258_v0 }
 0x40c   : > { %v1908_v50 = vpop.eup %1907 }
 0x40d   : > { %v1230_v51 = vmul.f32 %v1908_v50, %v1900_v27 }
 0x40f   : > { %v1231_v52 = vpack.c.bf16 %v1230_v51, %v1230_v51 }
 0x411   : > { %1722 = vmatmul.mubr.msk.bf16.vlgmr.msra.gmra.mxu0 %vm790_vm3, %v1231_v52 }
 0x44c   : > { %v890_v53 = vpop.f32.mrf.mxu0 }
 0x44d   : > { %v896_v54 = vpack.c.bf16 %v890_v53, %v890_v53 }
 0x44e   : > { %v1687_v55 = vpop.f32.mrf.mxu0 }
 0x44f   : > { %898 = vst.msk [vmem:[#allocation5] sm:$0xf] %vm897_vm5, %v896_v54 }
 0x450   : > { %v893_v56 = vpop.f32.mrf.mxu0 }
 0x452   : > { %v1688_v57 = vpop.f32.mrf.mxu0 }
 0x4c1   : > { %v1015_v58 = vpop.f32.mrf.mxu0 }
 0x4c2   : > { %v1622_v59 = vpack.c.bf16 %v1015_v58, %v1015_v58 }
 0x4c3   : > { %v1699_v60 = vpop.f32.mrf.mxu0 }
 0x4c4   : > { %1025 = vrot.lane.b32.xlu1 %v1622_v59, %s2263_s13  ;;  %s2266_s13 = smov [#allocation21]  }
 0x4c5   : > { %v1018_v61 = vpop.f32.mrf.mxu0  ;;  %s2153_s29 = sshll.u32 %s2266_s13, 4  ;;  %s2154_s29 = int_to_ptr.vmem [resolvable:$false] %s2153_s29 }
 0x4c6   : > { %s2155_s7 = scalar_lea.vmem %s2154_s29, 256  ;;  %p2156_p5 = scmp.lt.s32.totalorder %s2659_s21, %s2154_s29 }
 0x4c7   : > { %v1700_v62 = vpop.f32.mrf.mxu0  ;;  %p2157_p4 = scmp.lt.s32.totalorder %s2155_s7, %s2149_s20 }
 0x4c9   : > { %v1146_v1 = vpop.f32.mrf.mxu0  ;;  %p2158_p13 = por %p2157_p4, %p2156_p5 }
 0x4ca   : > { %v1623_v3 = vpack.c.bf16 %v1146_v1, %v1146_v1 }
 0x4cb   : > { %v1711_v4 = vpop.f32.mrf.mxu0  ;;  %p2159_p10 = pnand %p2158_p13, %p2152_p7 }
 0x4cc   : > { %1156 = vrot.lane.b32.xlu0 %v1623_v3, %s2264_s10 }
 0x4cd   : > { %v1149_v5 = vpop.f32.mrf.mxu0 }
 0x4cf   : > { %v1712_v6 = vpop.f32.mrf.mxu0 }
 0x4d1   : > { %v1277_v7 = vpop.f32.mrf.mxu0 }
 0x4d2   : > { %v1624_v8 = vpack.c.bf16 %v1277_v7, %v1277_v7 }
 0x4d3   : > { %v1723_v9 = vpop.f32.mrf.mxu0 }
 0x4d4   : > { %1287 = vrot.lane.b32.xlu1 %v1624_v8, %s2265_s14 }
 0x4d5   : > { %v1280_v10 = vpop.f32.mrf.mxu0 }
 0x4d7   : > { %v1724_v11 = vpop.f32.mrf.mxu0 }
 0x536   : > { %v1026_v12 = vpop.permute.xlu1 %1025 }
 0x537   : > { %1029 = vst.msk [vmem:[#allocation5] sm:$0xf] %vm1028_vm6, %v1026_v12 }
 0x53e   : > { %v1157_v0 = vpop.permute.xlu0 %1156 }
 0x53f   : > { %1160 = vst.msk [vmem:[#allocation5] sm:$0xf] %vm1159_vm7, %v1157_v0 }
 0x546   : > { %v1288_v13 = vpop.permute.xlu1 %1287 }
 0x547   : > { %1291 = vst.msk [vmem:[#allocation5] sm:$0xf] %vm1290_vm8, %v1288_v13 }
 0x54e   : > { %v1292_v14 = vld [vmem:[#allocation5] sm:$0xf] }
 0x54f   : > { %1730 = vmatmul.mubr.msk.bf16.vlgmr.msra.gmra.mxu1 %vm600_vm1, %v1292_v14 }
 0x60f   : > { %v1353_v16 = vpop.f32.mrf.mxu1 }
 0x610   : > { %v1354_v17 = vadd.f32 %v1614_v15, %v1353_v16 }
 0x611   : > { %v1731_v18 = vpop.f32.mrf.mxu1 }
 0x612   : > { %1359 = vst.msk [vmem:[%s570_s5] sm:$0xff] %vm600_vm1, %v1354_v17 }
 0x613   : > { %v1356_v19 = vpop.f32.mrf.mxu1 }
 0x614   : > { %2162 = shalt.err (!%p2159_p10)
}
 0x615   : > { %s2163_s30 = scalar_lea.hbm %s2657_s12, 128  ;;  %s2167_s10 = scalar_lea.hbm %s2772_s23, 256 }
 0x616   : > { %p2164_p12 = scmp.ne.s32.totalorder %s2657_s12, %s2163_s30  ;;  %p2168_p11 = scmp.lt.s32.totalorder %s2657_s12, %s2772_s23 }
 0x617   : > { %p2169_p2 = scmp.lt.s32.totalorder %s2167_s10, %s2163_s30 }
 0x618   : > { %p2165_p0 = pnand %p2164_p12, %p2773_p3 }
 0x619   : > { %p2170_p8 = por %p2169_p2, %p2168_p11 }
 0x61a   : > { %p2166_p9 = pneg %p2165_p0 }
 0x61c   : > { %p2171_p1 = pnand %p2170_p8, %p2166_p9 }
 0x61e   : > { %2174 = shalt.err (!%p2171_p1)
}
 0x61f   : > { %1763 = dma.vmem_to_hbm [thread:$0]  (%p2773_p3), %s2659_s21, 128, %s2657_s12, %s1361_s15   ;;  %v1732_v20 = vpop.f32.mrf.mxu1 }
 0x620 PF: > { %s2774_s25 = sld [smem:[#allocation28_spill]] }
 0x621   : > { %s2775_s22 = sld [smem:[#allocation33_spill]] }
 0x622   : > { %s2776_s11 = sld [smem:[#allocation30_spill]] }
 0x626   : > { %s1387_s26 = sand.u32 1, %s2774_s25  }
 0x627   : > { %p2777_p6 = scmp.ne.s32.totalorder %s2775_s22, 0  ;;  %s1388_s5 = scalar_lea.sflag [#allocation8], %s1387_s26 }
 0x628   : > { %p2778_p7 = scmp.ge.s32.totalorder %s2776_s11, 2 }
 0x62a   : > { %p1795_p5 = pnand %p2778_p7, %p2777_p6 }
 0x62c   : > { %p1796_p4 = pneg %p1795_p5 }
 0x62e   : > { %2220 = dma.done.wait (%p1796_p4), %s1388_s5, 128  }
 0x62f   : > { %2222 = vsyncadd (%p1796_p4), %s1388_s5, 4294967168  ;;  %s33_s22 = sadd.s32 1, %s2776_s11   ;;  %s2779_s28 = sld [smem:[#allocation32_spill]] }
 0x630   : > { %p30_p13 = scmp.ge.s32.totalorder %s33_s22, 4   ;;  %s2780_s20 = sld [smem:[#allocation29_spill]] }
 0x631   : > { %s2781_s21 = sld [smem:[#allocation31_spill]]  ;;  %s2782_s17 = smov %s2229_s18 }
 0x632   : > { %s2783_s18 = smov %s2233_s19  ;;  %32 = sbr.rel (!%p30_p13) target bundleno = 17 (0x11), region = 161 }
 0x635   : > { %s2784_s19 = smov %s2779_s28 }
 0x637   :  { %1393 = vsyncpa [#allocation7], 1 }
 0x638   :  { %1395 = vsyncpa [#allocation7 + $0x1], 1 }
 0x639   :  { %1396 = vsyncpa [#allocation10], 1 }
 0x63a   :  { %1398 = vsyncpa [#allocation10 + $0x1], 1 }
 0x63b   :  { %1399 = vsyncpa [#allocation13], 1 }
 0x63c   :  { %1400 = vsyncpa [#allocation16], 1 }
 0x63d   :  { %1401 = vsyncpa [#allocation19], 1 }
 0x63e   :  { %1402 = vsyncpa [#allocation8], 1 }
 0x63f   :  { %1404 = vsyncpa [#allocation8 + $0x1], 1 }

</bundles_post_ra>
